<compile_context>
chip_gen: v7x
topology: tpu7x:2x2x1
jax: 0.10.0
libtpu: 0.0.40
codegen_flags: <defaults>
</compile_context>

<pallas_src>
import functools

import jax
import jax.numpy as jnp
from jax import lax
from jax.experimental import pallas as pl
from jax.experimental.pallas import tpu as pltpu


_MiB = 1 << 20
# Working-set budget used to derive tile sizes.  Conservative enough to fit
# every generation once vmem_limit_bytes is raised (v7x has only 64 MiB of
# physical VMEM; v5e/v6e have 128 MiB but default scoped limits of 16/32 MiB).
_VMEM_BUDGET = 40 * _MiB
_VMEM_LIMIT_CAP = 56 * _MiB  # < 64 MiB physical on v7x; leaves compiler headroom.


def _ode_rhs_kernel(y_ref, a_ref, o_ref, acc_ref, *, precision):
    """Computes one (bm, tn) output tile; grid axis 2 is the contraction (K) axis."""

    @pl.when(pl.program_id(2) == 0)
    def _init():
        acc_ref[...] = jnp.zeros_like(acc_ref)

    # out[b, n] = sum_d y[b, d] * A[n, d]  ==  (y @ A^T) tile.
    # Contract dim 1 of y with dim 1 of A: MXU-native transposed-RHS matmul,
    # no XLU transpose and no wrapper-side A.T materialization.
    acc_ref[...] += lax.dot_general(
        y_ref[...],
        a_ref[...],
        dimension_numbers=(((1,), (1,)), ((), ())),
        preferred_element_type=jnp.float32,
        precision=precision,
    )

    @pl.when(pl.program_id(2) == pl.num_programs(2) - 1)
    def _finalize():
        o_ref[...] = acc_ref[...].astype(o_ref.dtype)


def _pick_tiles(B, D, in_itemsize, out_itemsize):
    """Derive (bm, tn, tk) from the VMEM budget (blocks are double-buffered)."""
    # --- N/K tile over D ----------------------------------------------------
    # Keep the whole A block resident while its double-buffered footprint is
    # modest; otherwise tile D in lane-aligned chunks so the kernel scales to
    # any D without blowing VMEM.
    if 2 * D * D * in_itemsize <= _VMEM_BUDGET // 2 or D % 128 != 0:
        # TODO(synk): very large D that is not a multiple of 128 falls back to a
        # full-D (untiled) A block; pad D to a multiple of 128 upstream if that
        # ever overflows VMEM.
        tn = tk = D
    else:
        tn = tk = max(t for t in (512, 256, 128) if D % t == 0)

    # --- batch tile ----------------------------------------------------------
    a_bytes = 2 * tn * tk * in_itemsize                 # A block, double-buffered
    per_row = (2 * tk * in_itemsize                     # y block, double-buffered
               + 2 * tn * out_itemsize                  # out block, double-buffered
               + tn * 4)                                # f32 accumulator scratch
    bm_cap = max(8, (_VMEM_BUDGET - a_bytes) // per_row)
    bm = int(min(B, 1024, bm_cap))
    if bm < B:
        # Round down for MXU M-dim fill / sublane packing (bf16 packs 16 rows).
        mult = 128 if bm >= 128 else (16 if in_itemsize < 4 else 8)
        bm = max(mult, (bm // mult) * mult)
    return bm, tn, tk


def ode_system_forward(t, y, A, *, compute_dtype=None, precision=None):
    """dy/dt[b] = A @ y[b]  (== y @ A^T row-wise), as a Pallas TPU kernel.

    `t` is kept for signature parity with the PyTorch module; it never enters
    the kernel for a linear time-invariant system.
    """
    # TODO(synk): the reference forward() body is `pass`; we implement the
    # standard LTI semantics implied by holding A as the only parameter.
    del t  # unused for the LTI right-hand side; removed from the pallas_call.

    B, D = y.shape
    assert A.shape == (D, D)
    out_dtype = y.dtype

    if compute_dtype is not None:
        # Halves HBM traffic in the mem-bound regime; accumulation stays f32.
        y = y.astype(compute_dtype)
        A = A.astype(compute_dtype)

    # Small-problem bypass: output last-dim < 128 forces masked partial stores
    # and the pallas_call launch + per-step overhead dwarfs the tiny matmul.
    if D < 128:
        return jnp.einsum("bd,nd->bn", y, A, precision=precision).astype(out_dtype)

    in_isz = jnp.dtype(y.dtype).itemsize
    out_isz = jnp.dtype(out_dtype).itemsize
    bm, tn, tk = _pick_tiles(B, D, in_isz, out_isz)
    grid = (pl.cdiv(B, bm), pl.cdiv(D, tn), pl.cdiv(D, tk))

    vmem_needed = (2 * bm * tk * in_isz + 2 * tn * tk * in_isz
                   + 2 * bm * tn * out_isz + bm * tn * 4)
    vmem_limit = int(min(max(int(vmem_needed * 1.25), 32 * _MiB), _VMEM_LIMIT_CAP))

    cost = pl.CostEstimate(
        flops=2 * B * D * D,
        transcendentals=0,
        bytes_accessed=B * D * in_isz + D * D * in_isz + B * D * out_isz,
    )

    kernel = functools.partial(_ode_rhs_kernel, precision=precision)

    return pl.pallas_call(
        kernel,
        out_shape=jax.ShapeDtypeStruct((B, D), out_dtype),
        grid_spec=pltpu.PrefetchScalarGridSpec(
            num_scalar_prefetch=0,
            grid=grid,
            in_specs=[
                # y: tiled over batch (i) and contraction (k).
                pl.BlockSpec((bm, tk), lambda i, j, k: (i, k)),
                # A: output-column tile (j) x contraction tile (k).  For small D
                # this is the full matrix with a constant index_map, so it stays
                # VMEM-resident and is not re-fetched across batch grid steps.
                pl.BlockSpec((tn, tk), lambda i, j, k: (j, k)),
            ],
            out_specs=pl.BlockSpec((bm, tn), lambda i, j, k: (i, j)),
            scratch_shapes=[pltpu.VMEM((bm, tn), jnp.float32)],
        ),
        compiler_params=pltpu.CompilerParams(
            # Batch and output-column tiles are independent -> parallel (lets
            # v7x shard across both TensorCores); K is a reduction axis.
            dimension_semantics=("parallel", "parallel", "arbitrary"),
            vmem_limit_bytes=vmem_limit,
        ),
        cost_estimate=cost,
    )(y, A)


if __name__ == "__main__":
    key = jax.random.PRNGKey(0)
    k_a, k_y, k_a2, k_y2 = jax.random.split(key, 4)
    t = jnp.float32(0.0)

    # --- Pallas path: D >= 128 so the kernel (not the bypass) runs. ----------
    B, D = 256, 256
    A = jax.random.normal(k_a, (D, D), dtype=jnp.float32) * 0.1
    y = jax.random.normal(k_y, (B, D), dtype=jnp.float32)

    dydt = jax.block_until_ready(ode_system_forward(t, y, A))
    ref = jnp.matmul(y, A.T, precision=lax.Precision.HIGHEST)
    assert dydt.shape == (B, D)
    assert jnp.allclose(dydt, ref, atol=1e-4, rtol=1e-4), "pallas path mismatch"

    # --- Small-problem bypass path (module-scale tiny shapes). ---------------
    Bs, Ds = 8, 32
    A_s = jax.random.normal(k_a2, (Ds, Ds), dtype=jnp.float32) * 0.1
    y_s = jax.random.normal(k_y2, (Bs, Ds), dtype=jnp.float32)
    dydt_s = jax.block_until_ready(ode_system_forward(t, y_s, A_s))
    ref_s = jnp.matmul(y_s, A_s.T, precision=lax.Precision.HIGHEST)
    assert dydt_s.shape == (Bs, Ds)
    assert jnp.allclose(dydt_s, ref_s, atol=1e-4, rtol=1e-4), "bypass mismatch"

    print("KERNEL_OK")
</pallas_src>

<mosaic_0001>
module attributes {stable_mosaic.version = 11 : i64} {
  func.func @_ode_rhs_kernel(%arg0: i32, %arg1: i32, %arg2: i32, %arg3: memref<256x256xf32, #tpu.memory_space<vmem>>, %arg4: memref<256x256xf32, #tpu.memory_space<vmem>>, %arg5: memref<256x256xf32, #tpu.memory_space<vmem>>, %arg6: memref<256x256xf32, #tpu.memory_space<vmem>>) attributes {dimension_semantics = [#tpu.dimension_semantics<parallel>, #tpu.dimension_semantics<parallel>, #tpu.dimension_semantics<arbitrary>], iteration_bounds = array<i64: 1, 1, 1>, scalar_prefetch = 0 : i64, scratch_operands = 1 : i64, tpu.core_type = #tpu.core_type<tc>, window_params = [{transform_indices = @transform_0, window_bounds = array<i64: 256, 256>}, {transform_indices = @transform_1, window_bounds = array<i64: 256, 256>}, {transform_indices = @transform_2, window_bounds = array<i64: 256, 256>}]} {
    %c0_i32 = arith.constant 0 : i32
    %0 = arith.cmpi eq, %arg2, %c0_i32 : i32
    %1 = arith.extui %0 : i1 to i32
    %c0_i32_0 = arith.constant 0 : i32
    %2 = arith.cmpi ne, %1, %c0_i32_0 : i32
    scf.if %2 {
      %cst_10 = arith.constant 0.000000e+00 : f32
      %12 = vector.broadcast %cst_10 : f32 to vector<256x256xf32>
      %c0_11 = arith.constant 0 : index
      %c0_12 = arith.constant 0 : index
      %13 = vector.load %arg6[%c0_11, %c0_12] : memref<256x256xf32, #tpu.memory_space<vmem>>, vector<256x256xf32>
      tpu.vector_store %arg6[%c0_11, %c0_12], %12 {strides = array<i32>} : memref<256x256xf32, #tpu.memory_space<vmem>>, vector<256x256xf32>,
    } else {
    }
    %c0 = arith.constant 0 : index
    %c0_1 = arith.constant 0 : index
    %3 = vector.load %arg6[%c0, %c0_1] : memref<256x256xf32, #tpu.memory_space<vmem>>, vector<256x256xf32>
    %c0_2 = arith.constant 0 : index
    %c0_3 = arith.constant 0 : index
    %4 = vector.load %arg3[%c0_2, %c0_3] : memref<256x256xf32, #tpu.memory_space<vmem>>, vector<256x256xf32>
    %c0_4 = arith.constant 0 : index
    %c0_5 = arith.constant 0 : index
    %5 = vector.load %arg4[%c0_4, %c0_5] : memref<256x256xf32, #tpu.memory_space<vmem>>, vector<256x256xf32>
    %cst = arith.constant dense<0.000000e+00> : vector<256x256xf32>
    %6 = tpu.matmul %4, %5, %cst {dimension_numbers = #tpu.dot_dimension_numbers<[1], [1], [0], [0], [0, 0, 1, 0], [], []>} : vector<256x256xf32>, vector<256x256xf32>, vector<256x256xf32> -> vector<256x256xf32>
    %7 = arith.addf %3, %6 : vector<256x256xf32>
    %c0_6 = arith.constant 0 : index
    %c0_7 = arith.constant 0 : index
    %8 = vector.load %arg6[%c0_6, %c0_7] : memref<256x256xf32, #tpu.memory_space<vmem>>, vector<256x256xf32>
    tpu.vector_store %arg6[%c0_6, %c0_7], %7 {strides = array<i32>} : memref<256x256xf32, #tpu.memory_space<vmem>>, vector<256x256xf32>,
    %c0_i32_8 = arith.constant 0 : i32
    %9 = arith.cmpi eq, %arg2, %c0_i32_8 : i32
    %10 = arith.extui %9 : i1 to i32
    %c0_i32_9 = arith.constant 0 : i32
    %11 = arith.cmpi ne, %10, %c0_i32_9 : i32
    scf.if %11 {
      %c0_10 = arith.constant 0 : index
      %c0_11 = arith.constant 0 : index
      %12 = vector.load %arg6[%c0_10, %c0_11] : memref<256x256xf32, #tpu.memory_space<vmem>>, vector<256x256xf32>
      %c0_12 = arith.constant 0 : index
      %c0_13 = arith.constant 0 : index
      %13 = vector.load %arg5[%c0_12, %c0_13] : memref<256x256xf32, #tpu.memory_space<vmem>>, vector<256x256xf32>
      tpu.vector_store %arg5[%c0_12, %c0_13], %12 {strides = array<i32>} : memref<256x256xf32, #tpu.memory_space<vmem>>, vector<256x256xf32>,
    } else {
    }
    return
  }
  func.func @transform_0(%arg0: i32, %arg1: i32, %arg2: i32) -> (i32, i32) {
    %c0_i32 = arith.constant 0 : i32
    return %arg0, %arg2 : i32, i32
  }
  func.func @transform_1(%arg0: i32, %arg1: i32, %arg2: i32) -> (i32, i32) {
    %c0_i32 = arith.constant 0 : i32
    return %arg1, %arg2 : i32, i32
  }
  func.func @transform_2(%arg0: i32, %arg1: i32, %arg2: i32) -> (i32, i32) {
    %c0_i32 = arith.constant 0 : i32
    return %arg0, %arg1 : i32, i32
  }
}

</mosaic_0001>

<bundles_post_ra>
// kernel: tpu_custom_call.1
= control target key start
LH: loop header
LB: loop body
LE: loop exit
PB: predicated region body
PF: predicated region fallthrough
CT: control target
= control target key end

     0   :  { %7 = vsyncpa [#allocation4], 0  ;;  %s1072_s0 = inlined_call_operand.hbm [shape: f32[256,256], index: 0, kind: input, shape index: {}]   ;;  %s1073_s1 = inlined_call_operand.hbm [shape: f32[256,256], index: 1, kind: input, shape index: {}]   ;;  %s1074_s2 = inlined_call_operand.hbm [shape: f32[256,256], index: 2, kind: output, shape index: {}]  }
   0x1   :  { %8 = vsyncpa [#allocation7], 0 }
   0x2   :  { %9 = vsyncpa [#allocation5], 0  ;;  %s1007_s9 = smov [#allocation3]   ;;  %s935_s13 = scalar_lea.hbm %s1072_s0, 8192 }
   0x3   :  { %s15_s10 = sshll.u32 %s1007_s9, 4  ;;  %p936_p0 = scmp.ne.s32.totalorder %s1072_s0, %s935_s13  ;;  %s16_s10 = int_to_ptr.vmem [resolvable:$true] %s15_s10 }
   0x4   :  { %p939_p1 = scmp.lt.u32.totalorder %s935_s13, %s1072_s0 }
   0x6   :  { %p941_p2 = pnand %p939_p1, %p936_p0 }
   0x8   :  { %944 = shalt.err (!%p941_p2)
}
   0x9   :  { %s945_s18 = scalar_lea.vmem %s16_s10, 8192  ;;  %p950_p4 = scmp.lt.s32.totalorder %s16_s10, %s16_s10 }
   0xa   :  { %p946_p3 = scmp.ne.s32.totalorder %s16_s10, %s945_s18  ;;  %p951_p5 = scmp.lt.s32.totalorder %s945_s18, %s945_s18 }
   0xc   :  { %p952_p6 = por %p951_p5, %p950_p4 }
   0xe   :  { %p953_p7 = pnand %p952_p6, %p946_p3 }
  0x10   :  { %956 = shalt.err (!%p953_p7)
}
  0x11   :  { %s1008_s19 = smov 256   ;;  %s1009_s20 = smov 16  }
  0x12   :  { %21 = dma.hbm_to_vmem [thread:$0]  %s1072_s0, 8192, %s16_s10, [#allocation4], %s1008_s19, %s1008_s19, %s1009_s20  }
  0x13   :  { %s1010_s23 = smov [#allocation6]   ;;  %s957_s27 = scalar_lea.hbm %s1073_s1, 8192 }
  0x14   :  { %s27_s24 = sshll.u32 %s1010_s23, 4  ;;  %p958_p8 = scmp.ne.s32.totalorder %s1073_s1, %s957_s27  ;;  %s28_s24 = int_to_ptr.vmem [resolvable:$true] %s27_s24 }
  0x15   :  { %p961_p9 = scmp.lt.u32.totalorder %s957_s27, %s1073_s1 }
  0x17   :  { %p963_p10 = pnand %p961_p9, %p958_p8 }
  0x19   :  { %966 = shalt.err (!%p963_p10)
}
  0x1a   :  { %s967_s4 = scalar_lea.vmem %s28_s24, 8192  ;;  %p972_p12 = scmp.lt.s32.totalorder %s28_s24, %s28_s24 }
  0x1b   :  { %p968_p11 = scmp.ne.s32.totalorder %s28_s24, %s967_s4  ;;  %p973_p13 = scmp.lt.s32.totalorder %s967_s4, %s967_s4 }
  0x1d   :  { %p974_p0 = por %p973_p13, %p972_p12 }
  0x1f   :  { %p975_p1 = pnand %p974_p0, %p968_p11 }
  0x21   :  { %978 = shalt.err (!%p975_p1)
}
  0x22   :  { %33 = dma.hbm_to_vmem [thread:$0]  %s1073_s1, 8192, %s28_s24, [#allocation7], %s1008_s19, %s1008_s19, %s1009_s20  }
  0x23   :  { %1001 = dma.done.wait [#allocation4], 8192  }
  0x24   :  { %1002 = vsyncadd [#allocation4], 4294959104 }
  0x25   :  { %1003 = dma.done.wait [#allocation7], 8192  }
  0x26   :  { %1004 = vsyncadd [#allocation7], 4294959104  ;;  %v237_v0 = vld [vmem:[#allocation6 + $0x8] sm:$0xff]  ;;  %v239_v1 = vld [vmem:[#allocation6 + $0x18] sm:$0xff]  ;;  %s1011_s1 = smov [#allocation8]  }
  0x27   :  { %v236_v2 = vld [vmem:[#allocation6] sm:$0xff]  ;;  %v834_v3 = vpack.c.bf16 %v239_v1, %v237_v0  ;;  %v238_v4 = vld [vmem:[#allocation6 + $0x10] sm:$0xff]  ;;  %v241_v5 = vld [vmem:[#allocation6 + $0x28] sm:$0xff]  ;;  %s821_s6 = sshll.u32 %s1011_s1, 4  ;;  %s822_s6 = int_to_ptr.vmem [resolvable:$true] %s821_s6 }
  0x28   :  { %v243_v6 = vld [vmem:[#allocation6 + $0x38] sm:$0xff]  ;;  %v836_v7 = vpack.c.bf16 %v238_v4, %v236_v2  ;;  %v240_v9 = vld [vmem:[#allocation6 + $0x20] sm:$0xff]  ;;  %v242_v10 = vld [vmem:[#allocation6 + $0x30] sm:$0xff]  ;;  %s979_s7 = scalar_lea.vmem %s822_s6, 8192  ;;  %p984_p3 = scmp.lt.s32.totalorder %s822_s6, %s822_s6 }
  0x29   :  { %v838_v8 = vpack.c.bf16 %v243_v6, %v241_v5  ;;  %835 = vmatprep.subr.bf16.mxu0 %v834_v3  ;;  %898 = vmatprep.subr.bf16.mxu1 %v834_v3  ;;  %v245_v11 = vld [vmem:[#allocation6 + $0x48] sm:$0xff]  ;;  %v247_v12 = vld [vmem:[#allocation6 + $0x58] sm:$0xff]  ;;  %v840_v13 = vpack.c.bf16 %v242_v10, %v240_v9  ;;  %v244_v15 = vld [vmem:[#allocation6 + $0x40] sm:$0xff]  ;;  %p980_p2 = scmp.ne.s32.totalorder %s822_s6, %s979_s7  ;;  %p985_p4 = scmp.lt.s32.totalorder %s979_s7, %s979_s7 }
  0x2a   :  { %837 = vmatpush1.bf16.xpose.msra.mxu0 %v836_v7  ;;  %914 = vmatpush1.bf16.xpose.msra.mxu1 %v836_v7  ;;  %v842_v14 = vpack.c.bf16 %v247_v12, %v245_v11  ;;  %v246_v16 = vld [vmem:[#allocation6 + $0x50] sm:$0xff]  ;;  %v249_v17 = vld [vmem:[#allocation6 + $0x68] sm:$0xff]  ;;  %v251_v18 = vld [vmem:[#allocation6 + $0x78] sm:$0xff] }
  0x2b   :  { %839 = vmatprep.subr.bf16.mxu0 %v838_v8  ;;  %899 = vmatprep.subr.bf16.mxu1 %v838_v8  ;;  %v844_v19 = vpack.c.bf16 %v246_v16, %v244_v15  ;;  %v846_v20 = vpack.c.bf16 %v251_v18, %v249_v17  ;;  %v248_v21 = vld [vmem:[#allocation6 + $0x60] sm:$0xff]  ;;  %v250_v22 = vld [vmem:[#allocation6 + $0x70] sm:$0xff]  ;;  %v173_v23 = vld [vmem:[#allocation3 + $0x8] sm:$0xff]  ;;  %p986_p5 = por %p985_p4, %p984_p3 }
  0x2c   :  { %v205_v24 = vld [vmem:[#allocation3 + $0x108] sm:$0xff]  ;;  %v255_v26 = vld [vmem:[#allocation6 + $0x98] sm:$0xff]  ;;  %364 = vmatprep.mubr.f32.mxu0 %v173_v23  ;;  %v848_v27 = vpack.c.bf16 %v250_v22, %v248_v21  ;;  %v252_v29 = vld [vmem:[#allocation6 + $0x80] sm:$0xff] }
  0x2d   :  { %v253_v25 = vld [vmem:[#allocation6 + $0x88] sm:$0xff]  ;;  %460 = vmatprep.mubr.f32.mxu1 %v205_v24  ;;  %v254_v30 = vld [vmem:[#allocation6 + $0x90] sm:$0xff]  ;;  %v259_v32 = vld [vmem:[#allocation6 + $0xb8] sm:$0xff]  ;;  %p987_p6 = pnand %p986_p5, %p980_p2 }
  0x2e   :  { %v850_v28 = vpack.c.bf16 %v255_v26, %v253_v25  ;;  %v257_v31 = vld [vmem:[#allocation6 + $0xa8] sm:$0xff]  ;;  %v852_v33 = vpack.c.bf16 %v254_v30, %v252_v29  ;;  %v256_v35 = vld [vmem:[#allocation6 + $0xa0] sm:$0xff]  ;;  %v258_v36 = vld [vmem:[#allocation6 + $0xb0] sm:$0xff] }
  0x2f   :  { %v854_v34 = vpack.c.bf16 %v259_v32, %v257_v31  ;;  %v261_v37 = vld [vmem:[#allocation6 + $0xc8] sm:$0xff]  ;;  %v263_v38 = vld [vmem:[#allocation6 + $0xd8] sm:$0xff]  ;;  %v856_v39 = vpack.c.bf16 %v258_v36, %v256_v35  ;;  %v260_v41 = vld [vmem:[#allocation6 + $0xc0] sm:$0xff] }
  0x30   :  { %v858_v40 = vpack.c.bf16 %v263_v38, %v261_v37  ;;  %v262_v42 = vld [vmem:[#allocation6 + $0xd0] sm:$0xff]  ;;  %v265_v43 = vld [vmem:[#allocation6 + $0xe8] sm:$0xff]  ;;  %v267_v44 = vld [vmem:[#allocation6 + $0xf8] sm:$0xff] }
  0x31   :  { %v860_v45 = vpack.c.bf16 %v262_v42, %v260_v41  ;;  %v862_v46 = vpack.c.bf16 %v267_v44, %v265_v43  ;;  %v264_v47 = vld [vmem:[#allocation6 + $0xe0] sm:$0xff]  ;;  %v266_v48 = vld [vmem:[#allocation6 + $0xf0] sm:$0xff]  ;;  %v269_v49 = vld [vmem:[#allocation6 + $0x108] sm:$0xff] }
  0x32   :  { %841 = vmatpush1.bf16.xpose.msra.mxu0 %v840_v13  ;;  %915 = vmatpush1.bf16.xpose.msra.mxu1 %v840_v13  ;;  %v271_v50 = vld [vmem:[#allocation6 + $0x118] sm:$0xff]  ;;  %v864_v51 = vpack.c.bf16 %v266_v48, %v264_v47  ;;  %v268_v53 = vld [vmem:[#allocation6 + $0x100] sm:$0xff]  ;;  %v270_v54 = vld [vmem:[#allocation6 + $0x110] sm:$0xff] }
  0x33   :  { %843 = vmatprep.subr.bf16.mxu0 %v842_v14  ;;  %900 = vmatprep.subr.bf16.mxu1 %v842_v14  ;;  %v866_v52 = vpack.c.bf16 %v271_v50, %v269_v49  ;;  %v273_v55 = vld [vmem:[#allocation6 + $0x128] sm:$0xff]  ;;  %v275_v56 = vld [vmem:[#allocation6 + $0x138] sm:$0xff]  ;;  %v868_v57 = vpack.c.bf16 %v270_v54, %v268_v53  ;;  %v272_v59 = vld [vmem:[#allocation6 + $0x120] sm:$0xff] }
  0x34   :  { %v870_v58 = vpack.c.bf16 %v275_v56, %v273_v55  ;;  %v274_v60 = vld [vmem:[#allocation6 + $0x130] sm:$0xff]  ;;  %v277_v61 = vld [vmem:[#allocation6 + $0x148] sm:$0xff]  ;;  %v279_v62 = vld [vmem:[#allocation6 + $0x158] sm:$0xff] }
  0x35   :  { %v872_v63 = vpack.c.bf16 %v274_v60, %v272_v59  ;;  %v874_v0 = vpack.c.bf16 %v279_v62, %v277_v61  ;;  %v276_v1 = vld [vmem:[#allocation6 + $0x140] sm:$0xff]  ;;  %v278_v2 = vld [vmem:[#allocation6 + $0x150] sm:$0xff]  ;;  %v281_v3 = vld [vmem:[#allocation6 + $0x168] sm:$0xff] }
  0x36   :  { %v283_v4 = vld [vmem:[#allocation6 + $0x178] sm:$0xff]  ;;  %v876_v5 = vpack.c.bf16 %v278_v2, %v276_v1  ;;  %v280_v7 = vld [vmem:[#allocation6 + $0x160] sm:$0xff]  ;;  %v282_v8 = vld [vmem:[#allocation6 + $0x170] sm:$0xff] }
  0x37   :  { %v878_v6 = vpack.c.bf16 %v283_v4, %v281_v3  ;;  %v285_v9 = vld [vmem:[#allocation6 + $0x188] sm:$0xff]  ;;  %v287_v10 = vld [vmem:[#allocation6 + $0x198] sm:$0xff]  ;;  %v880_v11 = vpack.c.bf16 %v282_v8, %v280_v7  ;;  %v284_v13 = vld [vmem:[#allocation6 + $0x180] sm:$0xff] }
  0x38   :  { %v882_v12 = vpack.c.bf16 %v287_v10, %v285_v9  ;;  %v286_v14 = vld [vmem:[#allocation6 + $0x190] sm:$0xff]  ;;  %v289_v15 = vld [vmem:[#allocation6 + $0x1a8] sm:$0xff]  ;;  %v291_v16 = vld [vmem:[#allocation6 + $0x1b8] sm:$0xff] }
  0x39   :  { %v884_v17 = vpack.c.bf16 %v286_v14, %v284_v13  ;;  %v886_v18 = vpack.c.bf16 %v291_v16, %v289_v15  ;;  %v293_v21 = vld [vmem:[#allocation6 + $0x1c8] sm:$0xff]  ;;  %v295_v22 = vld [vmem:[#allocation6 + $0x1d8] sm:$0xff]  ;;  %v292_v25 = vld [vmem:[#allocation6 + $0x1c0] sm:$0xff] }
  0x3a   :  { %845 = vmatpush1.bf16.xpose.msra.mxu0 %v844_v19  ;;  %916 = vmatpush1.bf16.xpose.msra.mxu1 %v844_v19  ;;  %v288_v19 = vld [vmem:[#allocation6 + $0x1a0] sm:$0xff]  ;;  %v890_v24 = vpack.c.bf16 %v295_v22, %v293_v21  ;;  %v294_v26 = vld [vmem:[#allocation6 + $0x1d0] sm:$0xff]  ;;  %v175_v36 = vld [vmem:[#allocation3 + $0x18] sm:$0xff] }
  0x3b   :  { %847 = vmatprep.subr.bf16.mxu0 %v846_v20  ;;  %901 = vmatprep.subr.bf16.mxu1 %v846_v20  ;;  %v290_v20 = vld [vmem:[#allocation6 + $0x1b0] sm:$0xff]  ;;  %v892_v29 = vpack.c.bf16 %v294_v26, %v292_v25  ;;  %v296_v31 = vld [vmem:[#allocation6 + $0x1e0] sm:$0xff]  ;;  %v207_v37 = vld [vmem:[#allocation3 + $0x118] sm:$0xff] }
  0x3c   :  { %v888_v23 = vpack.c.bf16 %v290_v20, %v288_v19  ;;  %v298_v32 = vld [vmem:[#allocation6 + $0x1f0] sm:$0xff]  ;;  %v204_v35 = vld [vmem:[#allocation3 + $0x100] sm:$0xff]  ;;  %v209_v41 = vld [vmem:[#allocation3 + $0x128] sm:$0xff] }
  0x3d   :  { %v174_v38 = vld [vmem:[#allocation3 + $0x10] sm:$0xff]  ;;  %v176_v42 = vld [vmem:[#allocation3 + $0x20] sm:$0xff]  ;;  %v179_v44 = vld [vmem:[#allocation3 + $0x38] sm:$0xff] }
  0x3e   :  { %v208_v43 = vld [vmem:[#allocation3 + $0x120] sm:$0xff]  ;;  %v210_v47 = vld [vmem:[#allocation3 + $0x130] sm:$0xff]  ;;  %v181_v48 = vld [vmem:[#allocation3 + $0x48] sm:$0xff] }
  0x3f   :  { %v213_v49 = vld [vmem:[#allocation3 + $0x148] sm:$0xff]  ;;  %v180_v50 = vld [vmem:[#allocation3 + $0x40] sm:$0xff]  ;;  %v215_v53 = vld [vmem:[#allocation3 + $0x158] sm:$0xff] }
  0x40   :  { %v182_v54 = vld [vmem:[#allocation3 + $0x50] sm:$0xff]  ;;  %v185_v56 = vld [vmem:[#allocation3 + $0x68] sm:$0xff]  ;;  %v216_v59 = vld [vmem:[#allocation3 + $0x160] sm:$0xff] }
  0x41   :  { %v214_v55 = vld [vmem:[#allocation3 + $0x150] sm:$0xff]  ;;  %v187_v60 = vld [vmem:[#allocation3 + $0x78] sm:$0xff]  ;;  %v221_v1 = vld [vmem:[#allocation3 + $0x188] sm:$0xff] }
  0x42   :  { %849 = vmatpush1.bf16.xpose.msra.mxu0 %v848_v27  ;;  %917 = vmatpush1.bf16.xpose.msra.mxu1 %v848_v27  ;;  %v297_v27 = vld [vmem:[#allocation6 + $0x1e8] sm:$0xff]  ;;  %v219_v61 = vld [vmem:[#allocation3 + $0x178] sm:$0xff]  ;;  %v186_v62 = vld [vmem:[#allocation3 + $0x70] sm:$0xff] }
  0x43   :  { %851 = vmatprep.subr.bf16.mxu0 %v850_v28  ;;  %902 = vmatprep.subr.bf16.mxu1 %v850_v28  ;;  %v299_v28 = vld [vmem:[#allocation6 + $0x1f8] sm:$0xff]  ;;  %v188_v2 = vld [vmem:[#allocation3 + $0x80] sm:$0xff]  ;;  %v222_v7 = vld [vmem:[#allocation3 + $0x190] sm:$0xff] }
  0x44   :  { %v894_v30 = vpack.c.bf16 %v299_v28, %v297_v27  ;;  %v220_v3 = vld [vmem:[#allocation3 + $0x180] sm:$0xff]  ;;  %v191_v4 = vld [vmem:[#allocation3 + $0x98] sm:$0xff]  ;;  %v193_v8 = vld [vmem:[#allocation3 + $0xa8] sm:$0xff] }
  0x45   :  { %v225_v9 = vld [vmem:[#allocation3 + $0x1a8] sm:$0xff]  ;;  %v192_v10 = vld [vmem:[#allocation3 + $0xa0] sm:$0xff]  ;;  %v227_v13 = vld [vmem:[#allocation3 + $0x1b8] sm:$0xff] }
  0x46   :  { %v194_v14 = vld [vmem:[#allocation3 + $0xb0] sm:$0xff]  ;;  %v197_v16 = vld [vmem:[#allocation3 + $0xc8] sm:$0xff]  ;;  %v228_v19 = vld [vmem:[#allocation3 + $0x1c0] sm:$0xff] }
  0x47   :  { %v226_v15 = vld [vmem:[#allocation3 + $0x1b0] sm:$0xff]  ;;  %v199_v20 = vld [vmem:[#allocation3 + $0xd8] sm:$0xff]  ;;  %v233_v25 = vld [vmem:[#allocation3 + $0x1e8] sm:$0xff] }
  0x48   :  { %v231_v21 = vld [vmem:[#allocation3 + $0x1d8] sm:$0xff]  ;;  %v198_v22 = vld [vmem:[#allocation3 + $0xd0] sm:$0xff]  ;;  %v200_v26 = vld [vmem:[#allocation3 + $0xe0] sm:$0xff] }
  0x49   :  { %v232_v27 = vld [vmem:[#allocation3 + $0x1e0] sm:$0xff]  ;;  %v203_v28 = vld [vmem:[#allocation3 + $0xf8] sm:$0xff] }
  0x4a   :  { %853 = vmatpush1.bf16.xpose.msra.mxu0 %v852_v33  ;;  %918 = vmatpush1.bf16.xpose.msra.mxu1 %v852_v33  ;;  %v896_v33 = vpack.c.bf16 %v298_v32, %v296_v31  ;;  %v234_v31 = vld [vmem:[#allocation3 + $0x1f0] sm:$0xff] }
  0x4b   :  { %855 = vmatprep.subr.bf16.mxu0 %v854_v34  ;;  %903 = vmatprep.subr.bf16.mxu1 %v854_v34  ;;  %v172_v34 = vld [vmem:[#allocation3] sm:$0xff] }
  0x52   :  { %857 = vmatpush1.bf16.xpose.msra.mxu0 %v856_v39  ;;  %919 = vmatpush1.bf16.xpose.msra.mxu1 %v856_v39  ;;  %v206_v39 = vld [vmem:[#allocation3 + $0x110] sm:$0xff] }
  0x53   :  { %859 = vmatprep.subr.bf16.mxu0 %v858_v40  ;;  %904 = vmatprep.subr.bf16.mxu1 %v858_v40  ;;  %v177_v40 = vld [vmem:[#allocation3 + $0x28] sm:$0xff] }
  0x5a   :  { %861 = vmatpush1.bf16.xpose.msra.mxu0 %v860_v45  ;;  %920 = vmatpush1.bf16.xpose.msra.mxu1 %v860_v45  ;;  %v211_v45 = vld [vmem:[#allocation3 + $0x138] sm:$0xff] }
  0x5b   :  { %863 = vmatprep.subr.bf16.mxu0 %v862_v46  ;;  %905 = vmatprep.subr.bf16.mxu1 %v862_v46  ;;  %v178_v46 = vld [vmem:[#allocation3 + $0x30] sm:$0xff] }
  0x62   :  { %865 = vmatpush1.bf16.xpose.msra.mxu0 %v864_v51  ;;  %921 = vmatpush1.bf16.xpose.msra.mxu1 %v864_v51  ;;  %v212_v51 = vld [vmem:[#allocation3 + $0x140] sm:$0xff] }
  0x63   :  { %867 = vmatprep.subr.bf16.mxu0 %v866_v52  ;;  %906 = vmatprep.subr.bf16.mxu1 %v866_v52  ;;  %v183_v52 = vld [vmem:[#allocation3 + $0x58] sm:$0xff] }
  0x6a   :  { %869 = vmatpush1.bf16.xpose.msra.mxu0 %v868_v57  ;;  %922 = vmatpush1.bf16.xpose.msra.mxu1 %v868_v57  ;;  %v217_v57 = vld [vmem:[#allocation3 + $0x168] sm:$0xff] }
  0x6b   :  { %871 = vmatprep.subr.bf16.mxu0 %v870_v58  ;;  %907 = vmatprep.subr.bf16.mxu1 %v870_v58  ;;  %v184_v58 = vld [vmem:[#allocation3 + $0x60] sm:$0xff] }
  0x72   :  { %873 = vmatpush1.bf16.xpose.msra.mxu0 %v872_v63  ;;  %923 = vmatpush1.bf16.xpose.msra.mxu1 %v872_v63  ;;  %v218_v63 = vld [vmem:[#allocation3 + $0x170] sm:$0xff] }
  0x73   :  { %875 = vmatprep.subr.bf16.mxu0 %v874_v0  ;;  %908 = vmatprep.subr.bf16.mxu1 %v874_v0  ;;  %v189_v0 = vld [vmem:[#allocation3 + $0x88] sm:$0xff] }
  0x7a   :  { %877 = vmatpush1.bf16.xpose.msra.mxu0 %v876_v5  ;;  %924 = vmatpush1.bf16.xpose.msra.mxu1 %v876_v5  ;;  %v223_v5 = vld [vmem:[#allocation3 + $0x198] sm:$0xff] }
  0x7b   :  { %879 = vmatprep.subr.bf16.mxu0 %v878_v6  ;;  %909 = vmatprep.subr.bf16.mxu1 %v878_v6  ;;  %v190_v6 = vld [vmem:[#allocation3 + $0x90] sm:$0xff] }
  0x82   :  { %881 = vmatpush1.bf16.xpose.msra.mxu0 %v880_v11  ;;  %925 = vmatpush1.bf16.xpose.msra.mxu1 %v880_v11  ;;  %v224_v11 = vld [vmem:[#allocation3 + $0x1a0] sm:$0xff] }
  0x83   :  { %883 = vmatprep.subr.bf16.mxu0 %v882_v12  ;;  %910 = vmatprep.subr.bf16.mxu1 %v882_v12  ;;  %v195_v12 = vld [vmem:[#allocation3 + $0xb8] sm:$0xff] }
  0x8a   :  { %885 = vmatpush1.bf16.xpose.msra.mxu0 %v884_v17  ;;  %926 = vmatpush1.bf16.xpose.msra.mxu1 %v884_v17  ;;  %v229_v17 = vld [vmem:[#allocation3 + $0x1c8] sm:$0xff] }
  0x8b   :  { %887 = vmatprep.subr.bf16.mxu0 %v886_v18  ;;  %911 = vmatprep.subr.bf16.mxu1 %v886_v18  ;;  %v196_v18 = vld [vmem:[#allocation3 + $0xc0] sm:$0xff] }
  0x92   :  { %889 = vmatpush1.bf16.xpose.msra.mxu0 %v888_v23  ;;  %927 = vmatpush1.bf16.xpose.msra.mxu1 %v888_v23  ;;  %v230_v23 = vld [vmem:[#allocation3 + $0x1d0] sm:$0xff] }
  0x93   :  { %891 = vmatprep.subr.bf16.mxu0 %v890_v24  ;;  %912 = vmatprep.subr.bf16.mxu1 %v890_v24  ;;  %v201_v24 = vld [vmem:[#allocation3 + $0xe8] sm:$0xff] }
  0x9a   :  { %893 = vmatpush1.bf16.xpose.msra.mxu0 %v892_v29  ;;  %928 = vmatpush1.bf16.xpose.msra.mxu1 %v892_v29  ;;  %v235_v29 = vld [vmem:[#allocation3 + $0x1f8] sm:$0xff] }
  0x9b   :  { %895 = vmatprep.subr.bf16.mxu0 %v894_v30  ;;  %913 = vmatprep.subr.bf16.mxu1 %v894_v30  ;;  %v202_v30 = vld [vmem:[#allocation3 + $0xf0] sm:$0xff] }
  0xa2   :  { %897 = vmatpush1.bf16.xpose.msra.mxu0 %v896_v33  ;;  %929 = vmatpush1.bf16.xpose.msra.mxu1 %v896_v33 }
  0xa9   :  { %365 = vmatmul.mubr.f32.vlgmr.msra.gmra.mrb[0].mxu0 %v172_v34  ;;  %461 = vmatmul.mubr.f32.vlgmr.msra.gmra.mrb[0].mxu1 %v204_v35 }
  0xaa   :  { %370 = vmatprep.mubr.f32.mxu0 %v175_v36  ;;  %466 = vmatprep.mubr.f32.mxu1 %v207_v37 }
  0xad   :  { %371 = vmatmul.mubr.f32.gmra.mrb[2].mxu0 %v174_v38  ;;  %467 = vmatmul.mubr.f32.gmra.mrb[2].mxu1 %v206_v39 }
  0xae   :  { %376 = vmatprep.mubr.f32.mxu0 %v177_v40  ;;  %472 = vmatprep.mubr.f32.mxu1 %v209_v41 }
  0xb1   :  { %377 = vmatmul.mubr.f32.gmra.mrb[4].mxu0 %v176_v42  ;;  %473 = vmatmul.mubr.f32.gmra.mrb[4].mxu1 %v208_v43 }
  0xb2   :  { %382 = vmatprep.mubr.f32.mxu0 %v179_v44  ;;  %478 = vmatprep.mubr.f32.mxu1 %v211_v45 }
  0xb5   :  { %383 = vmatmul.mubr.f32.gmra.mrb[6].mxu0 %v178_v46  ;;  %479 = vmatmul.mubr.f32.gmra.mrb[6].mxu1 %v210_v47 }
  0xb6   :  { %388 = vmatprep.mubr.f32.mxu0 %v181_v48  ;;  %484 = vmatprep.mubr.f32.mxu1 %v213_v49 }
  0xb9   :  { %389 = vmatmul.mubr.f32.gmra.mrb[8].mxu0 %v180_v50  ;;  %485 = vmatmul.mubr.f32.gmra.mrb[8].mxu1 %v212_v51 }
  0xba   :  { %394 = vmatprep.mubr.f32.mxu0 %v183_v52  ;;  %490 = vmatprep.mubr.f32.mxu1 %v215_v53 }
  0xbd   :  { %395 = vmatmul.mubr.f32.gmra.mrb[10].mxu0 %v182_v54  ;;  %491 = vmatmul.mubr.f32.gmra.mrb[10].mxu1 %v214_v55 }
  0xbe   :  { %400 = vmatprep.mubr.f32.mxu0 %v185_v56  ;;  %496 = vmatprep.mubr.f32.mxu1 %v217_v57 }
  0xc1   :  { %401 = vmatmul.mubr.f32.gmra.mrb[12].mxu0 %v184_v58  ;;  %497 = vmatmul.mubr.f32.gmra.mrb[12].mxu1 %v216_v59 }
  0xc2   :  { %406 = vmatprep.mubr.f32.mxu0 %v187_v60  ;;  %502 = vmatprep.mubr.f32.mxu1 %v219_v61 }
  0xc5   :  { %407 = vmatmul.mubr.f32.gmra.mrb[14].mxu0 %v186_v62  ;;  %503 = vmatmul.mubr.f32.gmra.mrb[14].mxu1 %v218_v63 }
  0xc6   :  { %412 = vmatprep.mubr.f32.mxu0 %v189_v0  ;;  %508 = vmatprep.mubr.f32.mxu1 %v221_v1 }
  0xc9   :  { %413 = vmatmul.mubr.f32.gmra.mrb[16].mxu0 %v188_v2  ;;  %509 = vmatmul.mubr.f32.gmra.mrb[16].mxu1 %v220_v3 }
  0xca   :  { %418 = vmatprep.mubr.f32.mxu0 %v191_v4  ;;  %514 = vmatprep.mubr.f32.mxu1 %v223_v5 }
  0xcd   :  { %419 = vmatmul.mubr.f32.gmra.mrb[18].mxu0 %v190_v6  ;;  %515 = vmatmul.mubr.f32.gmra.mrb[18].mxu1 %v222_v7 }
  0xce   :  { %424 = vmatprep.mubr.f32.mxu0 %v193_v8  ;;  %520 = vmatprep.mubr.f32.mxu1 %v225_v9 }
  0xd1   :  { %425 = vmatmul.mubr.f32.gmra.mrb[20].mxu0 %v192_v10  ;;  %521 = vmatmul.mubr.f32.gmra.mrb[20].mxu1 %v224_v11 }
  0xd2   :  { %430 = vmatprep.mubr.f32.mxu0 %v195_v12  ;;  %526 = vmatprep.mubr.f32.mxu1 %v227_v13 }
  0xd5   :  { %431 = vmatmul.mubr.f32.gmra.mrb[22].mxu0 %v194_v14  ;;  %527 = vmatmul.mubr.f32.gmra.mrb[22].mxu1 %v226_v15 }
  0xd6   :  { %436 = vmatprep.mubr.f32.mxu0 %v197_v16  ;;  %532 = vmatprep.mubr.f32.mxu1 %v229_v17 }
  0xd9   :  { %437 = vmatmul.mubr.f32.gmra.mrb[24].mxu0 %v196_v18  ;;  %533 = vmatmul.mubr.f32.gmra.mrb[24].mxu1 %v228_v19 }
  0xda   :  { %442 = vmatprep.mubr.f32.mxu0 %v199_v20  ;;  %538 = vmatprep.mubr.f32.mxu1 %v231_v21 }
  0xdd   :  { %443 = vmatmul.mubr.f32.gmra.mrb[26].mxu0 %v198_v22  ;;  %539 = vmatmul.mubr.f32.gmra.mrb[26].mxu1 %v230_v23 }
  0xde   :  { %448 = vmatprep.mubr.f32.mxu0 %v201_v24  ;;  %544 = vmatprep.mubr.f32.mxu1 %v233_v25 }
  0xe1   :  { %449 = vmatmul.mubr.f32.gmra.mrb[28].mxu0 %v200_v26  ;;  %545 = vmatmul.mubr.f32.gmra.mrb[28].mxu1 %v232_v27 }
  0xe2   :  { %454 = vmatprep.mubr.f32.mxu0 %v203_v28  ;;  %550 = vmatprep.mubr.f32.mxu1 %v235_v29 }
  0xe5   :  { %455 = vmatmul.mubr.f32.gmra.mrb[30].mxu0 %v202_v30  ;;  %551 = vmatmul.mubr.f32.gmra.mrb[30].mxu1 %v234_v31 }
 0x17c   :  { %v366_v32 = vpop.f32.mrb[0].mxu0  ;;  %v462_v33 = vpop.f32.mrb[0].mxu1 }
 0x17d   :  { %752 = vst [vmem:[#allocation8] sm:$0xff] %v366_v32  ;;  %784 = vst [vmem:[#allocation8 + $0x100] sm:$0xff] %v462_v33  ;;  %v368_v34 = vpop.f32.mrb[1].mxu0  ;;  %v464_v35 = vpop.f32.mrb[1].mxu1 }
 0x17e   :  { %753 = vst [vmem:[#allocation8 + $0x8] sm:$0xff] %v368_v34  ;;  %785 = vst [vmem:[#allocation8 + $0x108] sm:$0xff] %v464_v35 }
 0x180   :  { %v372_v36 = vpop.f32.mrb[2].mxu0  ;;  %v468_v37 = vpop.f32.mrb[2].mxu1 }
 0x181   :  { %754 = vst [vmem:[#allocation8 + $0x10] sm:$0xff] %v372_v36  ;;  %786 = vst [vmem:[#allocation8 + $0x110] sm:$0xff] %v468_v37  ;;  %v374_v38 = vpop.f32.mrb[3].mxu0  ;;  %v470_v39 = vpop.f32.mrb[3].mxu1 }
 0x182   :  { %755 = vst [vmem:[#allocation8 + $0x18] sm:$0xff] %v374_v38  ;;  %787 = vst [vmem:[#allocation8 + $0x118] sm:$0xff] %v470_v39 }
 0x184   :  { %v378_v40 = vpop.f32.mrb[4].mxu0  ;;  %v474_v41 = vpop.f32.mrb[4].mxu1 }
 0x185   :  { %756 = vst [vmem:[#allocation8 + $0x20] sm:$0xff] %v378_v40  ;;  %788 = vst [vmem:[#allocation8 + $0x120] sm:$0xff] %v474_v41  ;;  %v380_v42 = vpop.f32.mrb[5].mxu0  ;;  %v476_v43 = vpop.f32.mrb[5].mxu1 }
 0x186   :  { %757 = vst [vmem:[#allocation8 + $0x28] sm:$0xff] %v380_v42  ;;  %789 = vst [vmem:[#allocation8 + $0x128] sm:$0xff] %v476_v43 }
 0x188   :  { %v384_v44 = vpop.f32.mrb[6].mxu0  ;;  %v480_v45 = vpop.f32.mrb[6].mxu1 }
 0x189   :  { %758 = vst [vmem:[#allocation8 + $0x30] sm:$0xff] %v384_v44  ;;  %790 = vst [vmem:[#allocation8 + $0x130] sm:$0xff] %v480_v45  ;;  %v386_v46 = vpop.f32.mrb[7].mxu0  ;;  %v482_v47 = vpop.f32.mrb[7].mxu1 }
 0x18a   :  { %759 = vst [vmem:[#allocation8 + $0x38] sm:$0xff] %v386_v46  ;;  %791 = vst [vmem:[#allocation8 + $0x138] sm:$0xff] %v482_v47 }
 0x18c   :  { %v390_v48 = vpop.f32.mrb[8].mxu0  ;;  %v486_v49 = vpop.f32.mrb[8].mxu1 }
 0x18d   :  { %760 = vst [vmem:[#allocation8 + $0x40] sm:$0xff] %v390_v48  ;;  %792 = vst [vmem:[#allocation8 + $0x140] sm:$0xff] %v486_v49  ;;  %v392_v50 = vpop.f32.mrb[9].mxu0  ;;  %v488_v51 = vpop.f32.mrb[9].mxu1 }
 0x18e   :  { %761 = vst [vmem:[#allocation8 + $0x48] sm:$0xff] %v392_v50  ;;  %793 = vst [vmem:[#allocation8 + $0x148] sm:$0xff] %v488_v51 }
 0x190   :  { %v396_v52 = vpop.f32.mrb[10].mxu0  ;;  %v492_v53 = vpop.f32.mrb[10].mxu1 }
 0x191   :  { %762 = vst [vmem:[#allocation8 + $0x50] sm:$0xff] %v396_v52  ;;  %794 = vst [vmem:[#allocation8 + $0x150] sm:$0xff] %v492_v53  ;;  %v398_v54 = vpop.f32.mrb[11].mxu0  ;;  %v494_v55 = vpop.f32.mrb[11].mxu1 }
 0x192   :  { %763 = vst [vmem:[#allocation8 + $0x58] sm:$0xff] %v398_v54  ;;  %795 = vst [vmem:[#allocation8 + $0x158] sm:$0xff] %v494_v55 }
 0x194   :  { %v402_v56 = vpop.f32.mrb[12].mxu0  ;;  %v498_v57 = vpop.f32.mrb[12].mxu1 }
 0x195   :  { %764 = vst [vmem:[#allocation8 + $0x60] sm:$0xff] %v402_v56  ;;  %796 = vst [vmem:[#allocation8 + $0x160] sm:$0xff] %v498_v57  ;;  %v404_v58 = vpop.f32.mrb[13].mxu0  ;;  %v500_v59 = vpop.f32.mrb[13].mxu1 }
 0x196   :  { %765 = vst [vmem:[#allocation8 + $0x68] sm:$0xff] %v404_v58  ;;  %797 = vst [vmem:[#allocation8 + $0x168] sm:$0xff] %v500_v59 }
 0x198   :  { %v408_v60 = vpop.f32.mrb[14].mxu0  ;;  %v504_v61 = vpop.f32.mrb[14].mxu1 }
 0x199   :  { %766 = vst [vmem:[#allocation8 + $0x70] sm:$0xff] %v408_v60  ;;  %798 = vst [vmem:[#allocation8 + $0x170] sm:$0xff] %v504_v61  ;;  %v410_v62 = vpop.f32.mrb[15].mxu0  ;;  %v506_v63 = vpop.f32.mrb[15].mxu1 }
 0x19a   :  { %767 = vst [vmem:[#allocation8 + $0x78] sm:$0xff] %v410_v62  ;;  %799 = vst [vmem:[#allocation8 + $0x178] sm:$0xff] %v506_v63 }
 0x19c   :  { %v414_v0 = vpop.f32.mrb[16].mxu0  ;;  %v510_v1 = vpop.f32.mrb[16].mxu1 }
 0x19d   :  { %768 = vst [vmem:[#allocation8 + $0x80] sm:$0xff] %v414_v0  ;;  %800 = vst [vmem:[#allocation8 + $0x180] sm:$0xff] %v510_v1  ;;  %v416_v2 = vpop.f32.mrb[17].mxu0  ;;  %v512_v3 = vpop.f32.mrb[17].mxu1 }
 0x19e   :  { %769 = vst [vmem:[#allocation8 + $0x88] sm:$0xff] %v416_v2  ;;  %801 = vst [vmem:[#allocation8 + $0x188] sm:$0xff] %v512_v3 }
 0x1a0   :  { %v420_v4 = vpop.f32.mrb[18].mxu0  ;;  %v516_v5 = vpop.f32.mrb[18].mxu1 }
 0x1a1   :  { %770 = vst [vmem:[#allocation8 + $0x90] sm:$0xff] %v420_v4  ;;  %802 = vst [vmem:[#allocation8 + $0x190] sm:$0xff] %v516_v5  ;;  %v422_v6 = vpop.f32.mrb[19].mxu0  ;;  %v518_v7 = vpop.f32.mrb[19].mxu1 }
 0x1a2   :  { %771 = vst [vmem:[#allocation8 + $0x98] sm:$0xff] %v422_v6  ;;  %803 = vst [vmem:[#allocation8 + $0x198] sm:$0xff] %v518_v7 }
 0x1a4   :  { %v426_v8 = vpop.f32.mrb[20].mxu0  ;;  %v522_v9 = vpop.f32.mrb[20].mxu1 }
 0x1a5   :  { %772 = vst [vmem:[#allocation8 + $0xa0] sm:$0xff] %v426_v8  ;;  %804 = vst [vmem:[#allocation8 + $0x1a0] sm:$0xff] %v522_v9  ;;  %v428_v10 = vpop.f32.mrb[21].mxu0  ;;  %v524_v11 = vpop.f32.mrb[21].mxu1 }
 0x1a6   :  { %773 = vst [vmem:[#allocation8 + $0xa8] sm:$0xff] %v428_v10  ;;  %805 = vst [vmem:[#allocation8 + $0x1a8] sm:$0xff] %v524_v11 }
 0x1a8   :  { %v432_v12 = vpop.f32.mrb[22].mxu0  ;;  %v528_v13 = vpop.f32.mrb[22].mxu1 }
 0x1a9   :  { %774 = vst [vmem:[#allocation8 + $0xb0] sm:$0xff] %v432_v12  ;;  %806 = vst [vmem:[#allocation8 + $0x1b0] sm:$0xff] %v528_v13  ;;  %v434_v14 = vpop.f32.mrb[23].mxu0  ;;  %v530_v15 = vpop.f32.mrb[23].mxu1 }
 0x1aa   :  { %775 = vst [vmem:[#allocation8 + $0xb8] sm:$0xff] %v434_v14  ;;  %807 = vst [vmem:[#allocation8 + $0x1b8] sm:$0xff] %v530_v15 }
 0x1ac   :  { %v438_v16 = vpop.f32.mrb[24].mxu0  ;;  %v534_v17 = vpop.f32.mrb[24].mxu1 }
 0x1ad   :  { %776 = vst [vmem:[#allocation8 + $0xc0] sm:$0xff] %v438_v16  ;;  %808 = vst [vmem:[#allocation8 + $0x1c0] sm:$0xff] %v534_v17  ;;  %v440_v18 = vpop.f32.mrb[25].mxu0  ;;  %v536_v19 = vpop.f32.mrb[25].mxu1 }
 0x1ae   :  { %777 = vst [vmem:[#allocation8 + $0xc8] sm:$0xff] %v440_v18  ;;  %809 = vst [vmem:[#allocation8 + $0x1c8] sm:$0xff] %v536_v19 }
 0x1b0   :  { %v444_v20 = vpop.f32.mrb[26].mxu0  ;;  %v540_v21 = vpop.f32.mrb[26].mxu1 }
 0x1b1   :  { %778 = vst [vmem:[#allocation8 + $0xd0] sm:$0xff] %v444_v20  ;;  %810 = vst [vmem:[#allocation8 + $0x1d0] sm:$0xff] %v540_v21  ;;  %v446_v22 = vpop.f32.mrb[27].mxu0  ;;  %v542_v23 = vpop.f32.mrb[27].mxu1 }
 0x1b2   :  { %779 = vst [vmem:[#allocation8 + $0xd8] sm:$0xff] %v446_v22  ;;  %811 = vst [vmem:[#allocation8 + $0x1d8] sm:$0xff] %v542_v23 }
 0x1b4   :  { %v450_v24 = vpop.f32.mrb[28].mxu0  ;;  %v546_v25 = vpop.f32.mrb[28].mxu1 }
 0x1b5   :  { %780 = vst [vmem:[#allocation8 + $0xe0] sm:$0xff] %v450_v24  ;;  %812 = vst [vmem:[#allocation8 + $0x1e0] sm:$0xff] %v546_v25  ;;  %v452_v26 = vpop.f32.mrb[29].mxu0  ;;  %v548_v27 = vpop.f32.mrb[29].mxu1 }
 0x1b6   :  { %781 = vst [vmem:[#allocation8 + $0xe8] sm:$0xff] %v452_v26  ;;  %813 = vst [vmem:[#allocation8 + $0x1e8] sm:$0xff] %v548_v27 }
 0x1b8   :  { %v456_v28 = vpop.f32.mrb[30].mxu0  ;;  %v552_v29 = vpop.f32.mrb[30].mxu1 }
 0x1b9   :  { %782 = vst [vmem:[#allocation8 + $0xf0] sm:$0xff] %v456_v28  ;;  %814 = vst [vmem:[#allocation8 + $0x1f0] sm:$0xff] %v552_v29  ;;  %v458_v30 = vpop.f32.mrb[31].mxu0  ;;  %v554_v31 = vpop.f32.mrb[31].mxu1 }
 0x1ba   :  { %783 = vst [vmem:[#allocation8 + $0xf8] sm:$0xff] %v458_v30  ;;  %815 = vst [vmem:[#allocation8 + $0x1f8] sm:$0xff] %v554_v31 }
 0x1bb   :  { %990 = shalt.err (!%p987_p6)
}
 0x1bc   :  { %s991_s10 = scalar_lea.hbm %s1074_s2, 8192 }
 0x1bd   :  { %p992_p7 = scmp.ne.s32.totalorder %s1074_s2, %s991_s10  ;;  %p995_p8 = scmp.lt.u32.totalorder %s991_s10, %s1074_s2 }
 0x1bf   :  { %p997_p9 = pnand %p995_p8, %p992_p7 }
 0x1c1   :  { %1000 = shalt.err (!%p997_p9)
}
 0x1c2   :  { %827 = dma.vmem_to_hbm [thread:$0]  %s822_s6, 8192, %s1074_s2, [#allocation5], %s1008_s19, %s1008_s19, %s1009_s20  }
 0x1c3   :  { %1005 = dma.done.wait [#allocation5], 8192  }
 0x1c4   :  { %1006 = vsyncadd [#allocation5], 4294959104 }
 0x1c5   :  { %831 = vsyncpa [#allocation4], 1 }
 0x1c6   :  { %832 = vsyncpa [#allocation7], 1 }
 0x1c7   :  { %833 = vsyncpa [#allocation5], 1 }

</bundles_post_ra>
